<compile_context>
chip_gen: v6e
topology: v6e:2x2x1
jax: 0.10.0
libtpu: 0.0.40
codegen_flags: <defaults>
</compile_context>

<pallas_src>
import jax
import jax.numpy as jnp
from jax.experimental import pallas as pl
from jax.experimental.pallas import tpu as pltpu

LANE = 128


def _round_up(n: int, m: int) -> int:
    return ((n + m - 1) // m) * m


def mlp_kernel(x_ref, w1_ref, b1_ref, w2_ref, b2_ref, w3_ref, b3_ref, o_ref):
    x = x_ref[...]                                   # (TM, in_size) bf16

    # fc1 + ReLU  (bf16 MXU, f32 accumulate)
    h1 = jnp.dot(x, w1_ref[...], preferred_element_type=jnp.float32) + b1_ref[...]
    h1 = jnp.maximum(h1, 0.0)

    # fc2 + ReLU
    h2 = jnp.dot(h1.astype(w2_ref.dtype), w2_ref[...],
                 preferred_element_type=jnp.float32) + b2_ref[...]
    h2 = jnp.maximum(h2, 0.0)

    # fc3 + tanh
    h3 = jnp.dot(h2.astype(w3_ref.dtype), w3_ref[...],
                 preferred_element_type=jnp.float32) + b3_ref[...]
    o_ref[...] = jnp.tanh(h3).astype(o_ref.dtype)


def mlp_forward(x, params, *, tm: int = 256, compute_dtype=jnp.bfloat16):
    """x: (B, input_size) float32; params: dict with w1,b1,w2,b2,w3,b3.

    Weights are stored (in_features, out_features) — transposed vs PyTorch —
    so the kernel computes y = x @ W + b directly on the MXU.
    """
    w1, b1, w2, b2, w3, b3 = (params[k] for k in ("w1", "b1", "w2", "b2", "w3", "b3"))
    B, in_size = x.shape
    hidden = w1.shape[1]
    out_size = w3.shape[1]

    # --- zero-pad hidden / output lane dims to multiples of 128 (exact) ------
    hid_p = _round_up(hidden, LANE)
    out_p = _round_up(out_size, LANE)

    w1p = jnp.zeros((in_size, hid_p), compute_dtype).at[:, :hidden].set(w1.astype(compute_dtype))
    b1p = jnp.zeros((1, hid_p), jnp.float32).at[:, :hidden].set(b1)
    w2p = jnp.zeros((hid_p, hid_p), compute_dtype).at[:hidden, :hidden].set(w2.astype(compute_dtype))
    b2p = jnp.zeros((1, hid_p), jnp.float32).at[:, :hidden].set(b2)
    w3p = jnp.zeros((hid_p, out_p), compute_dtype).at[:hidden, :out_size].set(w3.astype(compute_dtype))
    b3p = jnp.zeros((1, out_p), jnp.float32).at[:, :out_size].set(b3)

    # --- tile the batch dimension --------------------------------------------
    tm_eff = min(tm, _round_up(B, 8))          # small batches: one 8-row-aligned tile
    b_pad = _round_up(B, tm_eff)
    x_p = x.astype(compute_dtype)
    if b_pad != B:
        x_p = jnp.pad(x_p, ((0, b_pad - B), (0, 0)))
    grid = (b_pad // tm_eff,)

    resident = lambda a: pl.BlockSpec(a.shape, lambda i: (0,) * a.ndim)  # stays in VMEM

    out_padded = pl.pallas_call(
        mlp_kernel,
        out_shape=jax.ShapeDtypeStruct((b_pad, out_p), jnp.float32),
        grid=grid,
        in_specs=[
            pl.BlockSpec((tm_eff, in_size), lambda i: (i, 0)),   # x: batch-tiled
            resident(w1p), resident(b1p),
            resident(w2p), resident(b2p),
            resident(w3p), resident(b3p),
        ],
        out_specs=pl.BlockSpec((tm_eff, out_p), lambda i: (i, 0)),
        compiler_params=pltpu.CompilerParams(
            dimension_semantics=("parallel",),   # megacore sharding on v7x
        ),
    )(x_p, w1p, b1p, w2p, b2p, w3p, b3p)

    return out_padded[:B, :out_size]


def init_params(key, input_size, output_size, hidden_size=40):
    """Deterministic init mimicking torch.nn.Linear (uniform +/- 1/sqrt(fan_in)).

    Weights are stored (in_features, out_features) — transposed relative to PyTorch.
    """
    ks = jax.random.split(key, 6)

    def linear(kw, kb, fan_in, fan_out):
        bound = 1.0 / jnp.sqrt(fan_in)
        w = jax.random.uniform(kw, (fan_in, fan_out), jnp.float32, -bound, bound)
        b = jax.random.uniform(kb, (1, fan_out), jnp.float32, -bound, bound)
        return w, b

    w1, b1 = linear(ks[0], ks[1], input_size, hidden_size)
    w2, b2 = linear(ks[2], ks[3], hidden_size, hidden_size)
    w3, b3 = linear(ks[4], ks[5], hidden_size, output_size)
    return {"w1": w1, "b1": b1, "w2": w2, "b2": b2, "w3": w3, "b3": b3}


def mlp_reference(x, p):
    h = jnp.maximum(x @ p["w1"] + p["b1"], 0.0)
    h = jnp.maximum(h @ p["w2"] + p["b2"], 0.0)
    return jnp.tanh(h @ p["w3"] + p["b3"])


if __name__ == "__main__":
    key = jax.random.PRNGKey(0)
    k_x, k_p, k_x2 = jax.random.split(key, 3)

    batch, input_size, output_size, hidden_size = 8, 16, 8, 40
    x = jax.random.normal(k_x, (batch, input_size), jnp.float32)
    params = init_params(k_p, input_size, output_size, hidden_size)

    # small-batch path (single grid step)
    out = mlp_forward(x, params)
    out = jax.block_until_ready(out)
    ref = mlp_reference(x, params)
    assert out.shape == (batch, output_size)
    # bf16 inputs/weights -> compare against f32 reference with a matching tolerance
    assert jnp.allclose(out, ref, atol=2e-2, rtol=2e-2), "mismatch vs JAX reference"

    # multi-tile path (exercises batch grid, pipelining and batch padding)
    batch2 = 300
    x2 = jax.random.normal(k_x2, (batch2, input_size), jnp.float32)
    out2 = jax.block_until_ready(mlp_forward(x2, params, tm=128))
    ref2 = mlp_reference(x2, params)
    assert out2.shape == (batch2, output_size)
    assert jnp.allclose(out2, ref2, atol=2e-2, rtol=2e-2), "mismatch vs JAX reference (tiled)"

    print("KERNEL_OK")
</pallas_src>

<mosaic_0001>
module attributes {stable_mosaic.version = 11 : i64} {
  func.func @mlp_kernel(%arg0: i32, %arg1: memref<8x16xbf16, #tpu.memory_space<vmem>>, %arg2: memref<16x128xbf16, #tpu.memory_space<vmem>>, %arg3: memref<1x128xf32, #tpu.memory_space<vmem>>, %arg4: memref<128x128xbf16, #tpu.memory_space<vmem>>, %arg5: memref<1x128xf32, #tpu.memory_space<vmem>>, %arg6: memref<128x128xbf16, #tpu.memory_space<vmem>>, %arg7: memref<1x128xf32, #tpu.memory_space<vmem>>, %arg8: memref<8x128xf32, #tpu.memory_space<vmem>>) attributes {dimension_semantics = [#tpu.dimension_semantics<parallel>], iteration_bounds = array<i64: 1>, scalar_prefetch = 0 : i64, scratch_operands = 0 : i64, tpu.core_type = #tpu.core_type<tc>, window_params = [{transform_indices = @transform_0, window_bounds = array<i64: 8, 16>}, {pipeline_mode = #tpu.pipeline_mode<synchronous>, transform_indices = @transform_1, window_bounds = array<i64: 16, 128>}, {pipeline_mode = #tpu.pipeline_mode<synchronous>, transform_indices = @transform_2, window_bounds = array<i64: 1, 128>}, {pipeline_mode = #tpu.pipeline_mode<synchronous>, transform_indices = @transform_3, window_bounds = array<i64: 128, 128>}, {pipeline_mode = #tpu.pipeline_mode<synchronous>, transform_indices = @transform_4, window_bounds = array<i64: 1, 128>}, {pipeline_mode = #tpu.pipeline_mode<synchronous>, transform_indices = @transform_5, window_bounds = array<i64: 128, 128>}, {pipeline_mode = #tpu.pipeline_mode<synchronous>, transform_indices = @transform_6, window_bounds = array<i64: 1, 128>}, {transform_indices = @transform_7, window_bounds = array<i64: 8, 128>}]} {
    %c0 = arith.constant 0 : index
    %c0_0 = arith.constant 0 : index
    %0 = vector.load %arg1[%c0, %c0_0] : memref<8x16xbf16, #tpu.memory_space<vmem>>, vector<8x16xbf16>
    %c0_1 = arith.constant 0 : index
    %c0_2 = arith.constant 0 : index
    %1 = vector.load %arg2[%c0_1, %c0_2] : memref<16x128xbf16, #tpu.memory_space<vmem>>, vector<16x128xbf16>
    %cst = arith.constant dense<0.000000e+00> : vector<8x128xf32>
    %2 = tpu.matmul %0, %1, %cst {dimension_numbers = #tpu.dot_dimension_numbers<[1], [0], [0], [1], [0, 0, 1, 1], [], []>} : vector<8x16xbf16>, vector<16x128xbf16>, vector<8x128xf32> -> vector<8x128xf32>
    %c0_3 = arith.constant 0 : index
    %c0_4 = arith.constant 0 : index
    %3 = vector.load %arg3[%c0_3, %c0_4] : memref<1x128xf32, #tpu.memory_space<vmem>>, vector<1x128xf32>
    %4 = vector.broadcast %3 : vector<1x128xf32> to vector<8x128xf32>
    %5 = arith.addf %2, %4 : vector<8x128xf32>
    %cst_5 = arith.constant 0.000000e+00 : f32
    %6 = vector.broadcast %cst_5 : f32 to vector<8x128xf32>
    %7 = arith.maximumf %5, %6 : vector<8x128xf32>
    %8 = arith.truncf %7 : vector<8x128xf32> to vector<8x128xbf16>
    %c0_6 = arith.constant 0 : index
    %c0_7 = arith.constant 0 : index
    %9 = vector.load %arg4[%c0_6, %c0_7] : memref<128x128xbf16, #tpu.memory_space<vmem>>, vector<128x128xbf16>
    %cst_8 = arith.constant dense<0.000000e+00> : vector<8x128xf32>
    %10 = tpu.matmul %8, %9, %cst_8 {dimension_numbers = #tpu.dot_dimension_numbers<[1], [0], [0], [1], [0, 0, 1, 1], [], []>} : vector<8x128xbf16>, vector<128x128xbf16>, vector<8x128xf32> -> vector<8x128xf32>
    %c0_9 = arith.constant 0 : index
    %c0_10 = arith.constant 0 : index
    %11 = vector.load %arg5[%c0_9, %c0_10] : memref<1x128xf32, #tpu.memory_space<vmem>>, vector<1x128xf32>
    %12 = vector.broadcast %11 : vector<1x128xf32> to vector<8x128xf32>
    %13 = arith.addf %10, %12 : vector<8x128xf32>
    %cst_11 = arith.constant 0.000000e+00 : f32
    %14 = vector.broadcast %cst_11 : f32 to vector<8x128xf32>
    %15 = arith.maximumf %13, %14 : vector<8x128xf32>
    %16 = arith.truncf %15 : vector<8x128xf32> to vector<8x128xbf16>
    %c0_12 = arith.constant 0 : index
    %c0_13 = arith.constant 0 : index
    %17 = vector.load %arg6[%c0_12, %c0_13] : memref<128x128xbf16, #tpu.memory_space<vmem>>, vector<128x128xbf16>
    %cst_14 = arith.constant dense<0.000000e+00> : vector<8x128xf32>
    %18 = tpu.matmul %16, %17, %cst_14 {dimension_numbers = #tpu.dot_dimension_numbers<[1], [0], [0], [1], [0, 0, 1, 1], [], []>} : vector<8x128xbf16>, vector<128x128xbf16>, vector<8x128xf32> -> vector<8x128xf32>
    %c0_15 = arith.constant 0 : index
    %c0_16 = arith.constant 0 : index
    %19 = vector.load %arg7[%c0_15, %c0_16] : memref<1x128xf32, #tpu.memory_space<vmem>>, vector<1x128xf32>
    %20 = vector.broadcast %19 : vector<1x128xf32> to vector<8x128xf32>
    %21 = arith.addf %18, %20 : vector<8x128xf32>
    %22 = math.tanh %21 : vector<8x128xf32>
    %c0_17 = arith.constant 0 : index
    %c0_18 = arith.constant 0 : index
    %23 = vector.load %arg8[%c0_17, %c0_18] : memref<8x128xf32, #tpu.memory_space<vmem>>, vector<8x128xf32>
    tpu.vector_store %arg8[%c0_17, %c0_18], %22 {strides = array<i32>} : memref<8x128xf32, #tpu.memory_space<vmem>>, vector<8x128xf32>,
    return
  }
  func.func @transform_0(%arg0: i32) -> (i32, i32) {
    %c0_i32 = arith.constant 0 : i32
    %c0_i32_0 = arith.constant 0 : i32
    return %arg0, %c0_i32 : i32, i32
  }
  func.func @transform_1(%arg0: i32) -> (i32, i32) {
    %c0_i32 = arith.constant 0 : i32
    %c0_i32_0 = arith.constant 0 : i32
    %c0_i32_1 = arith.constant 0 : i32
    return %c0_i32, %c0_i32_0 : i32, i32
  }
  func.func @transform_2(%arg0: i32) -> (i32, i32) {
    %c0_i32 = arith.constant 0 : i32
    %c0_i32_0 = arith.constant 0 : i32
    %c0_i32_1 = arith.constant 0 : i32
    return %c0_i32, %c0_i32_0 : i32, i32
  }
  func.func @transform_3(%arg0: i32) -> (i32, i32) {
    %c0_i32 = arith.constant 0 : i32
    %c0_i32_0 = arith.constant 0 : i32
    %c0_i32_1 = arith.constant 0 : i32
    return %c0_i32, %c0_i32_0 : i32, i32
  }
  func.func @transform_4(%arg0: i32) -> (i32, i32) {
    %c0_i32 = arith.constant 0 : i32
    %c0_i32_0 = arith.constant 0 : i32
    %c0_i32_1 = arith.constant 0 : i32
    return %c0_i32, %c0_i32_0 : i32, i32
  }
  func.func @transform_5(%arg0: i32) -> (i32, i32) {
    %c0_i32 = arith.constant 0 : i32
    %c0_i32_0 = arith.constant 0 : i32
    %c0_i32_1 = arith.constant 0 : i32
    return %c0_i32, %c0_i32_0 : i32, i32
  }
  func.func @transform_6(%arg0: i32) -> (i32, i32) {
    %c0_i32 = arith.constant 0 : i32
    %c0_i32_0 = arith.constant 0 : i32
    %c0_i32_1 = arith.constant 0 : i32
    return %c0_i32, %c0_i32_0 : i32, i32
  }
  func.func @transform_7(%arg0: i32) -> (i32, i32) {
    %c0_i32 = arith.constant 0 : i32
    %c0_i32_0 = arith.constant 0 : i32
    return %arg0, %c0_i32 : i32, i32
  }
}

</mosaic_0001>

<bundles_post_ra>
// kernel: tpu_custom_call.1
= control target key start
LH: loop header
LB: loop body
LE: loop exit
PB: predicated region body
PF: predicated region fallthrough
CT: control target
= control target key end

     0   :  { %12 = vsyncpa [#allocation3], 0  ;;  %s711_s0 = inlined_call_operand.hbm [shape: bf16[8,16], index: 0, kind: input, shape index: {}]   ;;  %s712_s1 = inlined_call_operand.hbm [shape: bf16[16,128], index: 1, kind: input, shape index: {}]   ;;  %s713_s2 = inlined_call_operand.vmem [shape: f32[1,128], index: 2, kind: input, shape index: {}]   ;;  %s714_s3 = inlined_call_operand.hbm [shape: bf16[128,128], index: 3, kind: input, shape index: {}]   ;;  %s715_s4 = inlined_call_operand.vmem [shape: f32[1,128], index: 4, kind: input, shape index: {}]   ;;  %s716_s5 = inlined_call_operand.hbm [shape: bf16[128,128], index: 5, kind: input, shape index: {}]   ;;  %s717_s6 = inlined_call_operand.vmem [shape: f32[1,128], index: 6, kind: input, shape index: {}]   ;;  %s718_s7 = inlined_call_operand.hbm [shape: f32[8,128], index: 7, kind: output, shape index: {}]  }
   0x1   :  { %13 = vsyncpa [#allocation6], 0 }
   0x2   :  { %14 = vsyncpa [#allocation9], 0 }
   0x3   :  { %15 = vsyncpa [#allocation4], 0  ;;  %s609_s24 = smov [#allocation5]  }
   0x4   :  { %s31_s25 = sshll.u32 %s609_s24, 4  ;;  %s32_s25 = int_to_ptr.vmem [resolvable:$true] %s31_s25 }
   0x5   :  { %s509_s26 = scalar_lea.vmem %s32_s25, 128  ;;  %p514_p1 = scmp.lt.s32.totalorder %s32_s25, %s32_s25 }
   0x6   :  { %p510_p0 = scmp.ne.s32.totalorder %s32_s25, %s509_s26  ;;  %p515_p2 = scmp.lt.s32.totalorder %s509_s26, %s509_s26 }
   0x8   :  { %p516_p3 = por %p515_p2, %p514_p1 }
   0xa   :  { %p517_p4 = pnand %p516_p3, %p510_p0 }
   0xc   :  { %520 = shalt.err (!%p517_p4)
}
   0xd   :  { %s610_s27 = smov 64   ;;  %s611_s28 = smov 4  }
   0xe   :  { %37 = dma.hbm_to_vmem [thread:$0]  %s712_s1, 128, %s32_s25, [#allocation6], %s610_s27, %s610_s27, %s611_s28  }
   0xf   :  { %s612_s8 = smov [#allocation2]   ;;  %s613_s10 = smov [#allocation7]  }
  0x10   :  { %s22_s9 = sshll.u32 %s612_s8, 4  ;;  %s45_s11 = sshll.u32 %s613_s10, 4  ;;  %s23_s9 = int_to_ptr.vmem [resolvable:$true] %s22_s9  ;;  %s46_s11 = int_to_ptr.vmem [resolvable:$true] %s45_s11 }
  0x11   :  { %s529_s12 = scalar_lea.vmem %s23_s9, 64  ;;  %p534_p6 = scmp.lt.s32.totalorder %s23_s9, %s23_s9 }
  0x12   :  { %p530_p5 = scmp.ne.s32.totalorder %s23_s9, %s529_s12  ;;  %p535_p7 = scmp.lt.s32.totalorder %s529_s12, %s529_s12 }
  0x14   :  { %p536_p8 = por %p535_p7, %p534_p6 }
  0x16   :  { %p537_p9 = pnand %p536_p8, %p530_p5 }
  0x18   :  { %540 = shalt.err (!%p537_p9)
}
  0x19   :  { %25 = dma.hbm_to_vmem [thread:$0]  %s711_s0, 64, %s23_s9, [#allocation3]  }
  0x1a   :  { %s549_s15 = scalar_lea.vmem %s46_s11, 1024  ;;  %p554_p11 = scmp.lt.s32.totalorder %s46_s11, %s46_s11 }
  0x1b   :  { %p550_p10 = scmp.ne.s32.totalorder %s46_s11, %s549_s15  ;;  %p555_p12 = scmp.lt.s32.totalorder %s549_s15, %s549_s15 }
  0x1d   :  { %p556_p13 = por %p555_p12, %p554_p11 }
  0x1f   :  { %p557_p0 = pnand %p556_p13, %p550_p10 }
  0x21   :  { %560 = shalt.err (!%p557_p0)
}
  0x22   :  { %51 = dma.hbm_to_vmem [thread:$0]  %s714_s3, 1024, %s46_s11, [#allocation6], %s610_s27, %s610_s27, %s611_s28  }
  0x23   :  { %s614_s17 = smov [#allocation8]  }
  0x24   :  { %s59_s18 = sshll.u32 %s614_s17, 4  ;;  %s60_s18 = int_to_ptr.vmem [resolvable:$true] %s59_s18 }
  0x25   :  { %s569_s19 = scalar_lea.vmem %s60_s18, 1024  ;;  %p574_p2 = scmp.lt.s32.totalorder %s60_s18, %s60_s18 }
  0x26   :  { %p570_p1 = scmp.ne.s32.totalorder %s60_s18, %s569_s19  ;;  %p575_p3 = scmp.lt.s32.totalorder %s569_s19, %s569_s19 }
  0x28   :  { %p576_p4 = por %p575_p3, %p574_p2 }
  0x2a   :  { %p577_p5 = pnand %p576_p4, %p570_p1 }
  0x2c   :  { %580 = shalt.err (!%p577_p5)
}
  0x2d   :  { %65 = dma.hbm_to_vmem [thread:$0]  %s716_s5, 1024, %s60_s18, [#allocation9], %s610_s27, %s610_s27, %s611_s28  }
  0x2e   :  { %601 = dma.done.wait [#allocation3], 64  }
  0x2f   :  { %602 = vsyncadd [#allocation3], 4294967232 }
  0x30   :  { %603 = dma.done.wait [#allocation6], 1152  }
  0x31   :  { %604 = vsyncadd [#allocation6], 4294966144 }
  0x32   :  { %605 = dma.done.wait [#allocation9], 1024  }
  0x33   :  { %606 = vsyncadd [#allocation9], 4294966272  ;;  %v615_v0 = vmov 0.0   ;;  %vm616_vm0 = vmmov 0   ;;  %v482_v1 = vld [vmem:[#allocation5] sm:$0xff]   ;;  %vm97_vm1 = vcmask 130048  }
  0x34   :  { %427 = vmatprep.subr.bf16.mxu0 %v615_v0  ;;  %429 = vmatprep.mubr.msk.bf16.mxu0 %vm616_vm0, %v615_v0  ;;  %v81_v2 = vld [vmem:[#allocation2] sm:$0xf]  ;;  %v483_v3 = vld [vmem:[#allocation7 + $0x38] sm:$0xff]   ;;  %v485_v5 = vld [vmem:[#allocation7 + $0x28] sm:$0xff]   ;;  %s617_s24 = smov [#allocation10]  }
  0x35   :  { %433 = vmatprep.subr.bf16.mxu1 %v615_v0  ;;  %449 = vmatprep.mubr.msk.bf16.mxu1 %vm616_vm0, %v615_v0  ;;  %v484_v4 = vld [vmem:[#allocation7 + $0x30] sm:$0xff]   ;;  %v486_v6 = vld [vmem:[#allocation7 + $0x20] sm:$0xff]   ;;  %v487_v7 = vld [vmem:[#allocation7 + $0x18] sm:$0xff]  }
  0x36   :  { %428 = vmatpush3.bf16.msra.mxu0 %v482_v1  ;;  %434 = vmatpush3.bf16.msra.mxu1 %v483_v3  ;;  %v488_v8 = vld [vmem:[#allocation7 + $0x10] sm:$0xff]   ;;  %v489_v9 = vld [vmem:[#allocation7 + $0x8] sm:$0xff]   ;;  %v490_v10 = vld [vmem:[#allocation7] sm:$0xff]  }
  0x37   :  { %453 = vmatprep.subr.bf16.mxu0 %v615_v0  ;;  %435 = vmatprep.subr.bf16.mxu1 %v615_v0  ;;  %v491_v11 = vld [vmem:[#allocation8 + $0x38] sm:$0xff]   ;;  %v492_v12 = vld [vmem:[#allocation8 + $0x30] sm:$0xff]   ;;  %v493_v13 = vld [vmem:[#allocation8 + $0x28] sm:$0xff]  }
  0x38   :  { %v494_v14 = vld [vmem:[#allocation8 + $0x20] sm:$0xff]   ;;  %v495_v15 = vld [vmem:[#allocation8 + $0x18] sm:$0xff]   ;;  %v496_v16 = vld [vmem:[#allocation8 + $0x10] sm:$0xff]  }
  0x39   :  { %430 = vmatmul.mubr.msk.bf16.vlgmr.msra.gmra.mxu0 %vm97_vm1, %v81_v2  ;;  %v386_v17 = vld [vmem:[%s713_s2] ss:$0 sm:$0xff]  ;;  %v497_v25 = vld [vmem:[#allocation8 + $0x8] sm:$0xff]   ;;  %v498_v26 = vld [vmem:[#allocation8] sm:$0xff]  }
  0x3a   :  { %469 = vmatprep.mubr.msk.bf16.mxu0 %vm616_vm0, %v615_v0  ;;  %436 = vmatpush3.bf16.msra.mxu1 %v484_v4  ;;  %v389_v27 = vld [vmem:[%s715_s4] ss:$0 sm:$0xff]  ;;  %s375_s4 = sshll.u32 %s617_s24, 4  ;;  %s376_s4 = int_to_ptr.vmem [resolvable:$true] %s375_s4 }
  0x3b   :  { %437 = vmatprep.subr.bf16.mxu1 %v615_v0  ;;  %454 = vmatpush3.bf16.msra.mxu0 %v491_v11  ;;  %v398_v35 = vld [vmem:[%s717_s6] ss:$0 sm:$0xff]  ;;  %s581_s25 = scalar_lea.vmem %s376_s4, 128  ;;  %p586_p7 = scmp.lt.s32.totalorder %s376_s4, %s376_s4 }
  0x3c   :  { %455 = vmatprep.subr.bf16.mxu0 %v615_v0  ;;  %p582_p6 = scmp.ne.s32.totalorder %s376_s4, %s581_s25  ;;  %p587_p8 = scmp.lt.s32.totalorder %s581_s25, %s581_s25 }
  0x3e   :  { %438 = vmatpush3.bf16.msra.mxu1 %v485_v5  ;;  %p588_p9 = por %p587_p8, %p586_p7 }
  0x3f   :  { %439 = vmatprep.subr.bf16.mxu1 %v615_v0  ;;  %456 = vmatpush3.bf16.msra.mxu0 %v492_v12 }
  0x40   :  { %457 = vmatprep.subr.bf16.mxu0 %v615_v0  ;;  %p589_p10 = pnand %p588_p9, %p582_p6 }
  0x42   :  { %440 = vmatpush3.bf16.msra.mxu1 %v486_v6 }
  0x43   :  { %441 = vmatprep.subr.bf16.mxu1 %v615_v0  ;;  %458 = vmatpush3.bf16.msra.mxu0 %v493_v13 }
  0x44   :  { %459 = vmatprep.subr.bf16.mxu0 %v615_v0 }
  0x46   :  { %442 = vmatpush3.bf16.msra.mxu1 %v487_v7 }
  0x47   :  { %443 = vmatprep.subr.bf16.mxu1 %v615_v0  ;;  %460 = vmatpush3.bf16.msra.mxu0 %v494_v14 }
  0x48   :  { %461 = vmatprep.subr.bf16.mxu0 %v615_v0 }
  0x4a   :  { %444 = vmatpush3.bf16.msra.mxu1 %v488_v8 }
  0x4b   :  { %445 = vmatprep.subr.bf16.mxu1 %v615_v0  ;;  %462 = vmatpush3.bf16.msra.mxu0 %v495_v15 }
  0x4c   :  { %463 = vmatprep.subr.bf16.mxu0 %v615_v0 }
  0x4e   :  { %446 = vmatpush3.bf16.msra.mxu1 %v489_v9 }
  0x4f   :  { %447 = vmatprep.subr.bf16.mxu1 %v615_v0  ;;  %464 = vmatpush3.bf16.msra.mxu0 %v496_v16 }
  0x50   :  { %465 = vmatprep.subr.bf16.mxu0 %v615_v0 }
  0x52   :  { %448 = vmatpush3.bf16.msra.mxu1 %v490_v10 }
  0x53   :  { %466 = vmatpush3.bf16.msra.mxu0 %v497_v25 }
  0x54   :  { %467 = vmatprep.subr.bf16.mxu0 %v615_v0 }
  0x57   :  { %468 = vmatpush3.bf16.msra.mxu0 %v498_v26 }
  0xf9   :  { %v135_v18 = vpop.f32.mrf.mxu0 }
  0xfa   :  { %v136_v19 = vadd.f32 %v386_v17, %v135_v18 }
  0xfb   :  { %v431_v20 = vpop.f32.mrf.mxu0 }
  0xfc   :  { %v141_v21 = vmax.f32 %v136_v19, 0.0 }
  0xfd   :  { %v138_v22 = vpop.f32.mrf.mxu0 }
  0xfe   :  { %v142_v23 = vpack.c.bf16 %v141_v21, %v141_v21 }
  0xff   :  { %v432_v24 = vpop.f32.mrf.mxu0 }
 0x100   :  { %450 = vmatmul.mubr.bf16.vlgmr.msra.gmra.mxu1 %v142_v23 }
 0x1c0   :  { %v248_v28 = vpop.f32.mrf.mxu1 }
 0x1c1   :  { %v249_v29 = vadd.f32 %v389_v27, %v248_v28 }
 0x1c2   :  { %v451_v30 = vpop.f32.mrf.mxu1 }
 0x1c3   :  { %v254_v31 = vmax.f32 %v249_v29, 0.0 }
 0x1c4   :  { %v251_v32 = vpop.f32.mrf.mxu1 }
 0x1c5   :  { %v255_v33 = vpack.c.bf16 %v254_v31, %v254_v31 }
 0x1c6   :  { %v452_v34 = vpop.f32.mrf.mxu1 }
 0x1c7   :  { %470 = vmatmul.mubr.bf16.vlgmr.msra.gmra.mxu0 %v255_v33 }
 0x287   :  { %v361_v36 = vpop.f32.mrf.mxu0 }
 0x288   :  { %v362_v37 = vadd.f32 %v398_v35, %v361_v36 }
 0x289   :  { %v471_v38 = vpop.f32.mrf.mxu0 }
 0x28a   :  { %499 = vtanh.f32 %v362_v37 }
 0x28b   :  { %v364_v39 = vpop.f32.mrf.mxu0 }
 0x28d   :  { %v472_v40 = vpop.f32.mrf.mxu0 }
 0x297   :  { %v500_v41 = vpop.eup %499 }
 0x298   :  { %368 = vst [vmem:[#allocation10] sm:$0xff] %v500_v41 }
 0x299   :  { %592 = shalt.err (!%p589_p10)
}
 0x29a   :  { %378 = dma.vmem_to_hbm [thread:$0]  %s376_s4, 128, %s718_s7, [#allocation4]  }
 0x29b   :  { %607 = dma.done.wait [#allocation4], 128  }
 0x29c   :  { %608 = vsyncadd [#allocation4], 4294967168 }
 0x29d   :  { %382 = vsyncpa [#allocation3], 1 }
 0x29e   :  { %383 = vsyncpa [#allocation6], 1 }
 0x29f   :  { %384 = vsyncpa [#allocation9], 1 }
 0x2a0   :  { %385 = vsyncpa [#allocation4], 1 }

</bundles_post_ra>
